<compile_context>
chip_gen: v5e
topology: v5e:2x2
jax: 0.10.0
libtpu: 0.0.40
codegen_flags: <defaults>
</compile_context>

<pallas_src>
import functools

import jax
import jax.numpy as jnp
import numpy as np
from jax import lax
from jax.experimental import pallas as pl
from jax.experimental.pallas import tpu as pltpu

_LANES = 128
_NEG_BIG = -1e30


def _splat(x, shape):
    """Broadcast a 0-d value to `shape` (lane-dense, unmasked store)."""
    return jnp.broadcast_to(jnp.reshape(x, (1,) * len(shape)), shape)


def _round_up(x, m):
    return ((x + m - 1) // m) * m


def _vmem_cap_bytes():
    """Physical VMEM of the local chip (64 MiB on v7x, 128 MiB on v5e/v6e)."""
    try:
        info = pltpu.get_tpu_info()
        cap = int(getattr(info, "vmem_capacity_bytes", 64 << 20))
        return max(cap, 32 << 20)
    except Exception:
        return 64 << 20


# ---------------------------------------------------------------------------
# Kernel 1: LM head (hidden @ W_lm) + token-level cross entropy (ignore -100).
# grid = (V_pad//tv  [outer, streamed vocab], BS_pad//tm  [inner, row tiles]).
# Each W tile is loaded exactly once; online logsumexp state per row tile is
# carried in persistent VMEM scratch and finalized on the last vocab tile.
# Both axes are marked "arbitrary": the vocab axis carries state, and
# parallel-vs-arbitrary does not change single-core codegen; keeping the
# reduction axis outermost is what buys the W_lm reuse.
# ---------------------------------------------------------------------------
def ce_kernel(h_ref, w_ref, lab_ref, loss_ref, cnt_ref, m_sc, l_sc, p_sc,
              *, tm, tv, v_real):
    j = pl.program_id(0)              # vocab tile (outer)
    i = pl.program_id(1)              # row tile (inner)
    nj = pl.num_programs(0)

    @pl.when(j == 0)
    def _():
        m_sc[i] = jnp.full((tm, 1), -jnp.inf, jnp.float32)
        l_sc[i] = jnp.zeros((tm, 1), jnp.float32)
        p_sc[i] = jnp.zeros((tm, 1), jnp.float32)

    labels = lab_ref[...]                                         # (tm, 1) i32

    # bf16 x bf16 -> f32 accumulate on the MXU
    logits = jnp.dot(h_ref[...], w_ref[...],
                     preferred_element_type=jnp.float32)          # (tm, tv)

    vocab_ids = lax.broadcasted_iota(jnp.int32, logits.shape, 1) + j * tv
    if v_real is not None:
        # padded vocab columns: exclude from max / exp / label gather
        logits = jnp.where(vocab_ids < v_real, logits, _NEG_BIG)

    # online logsumexp across the streamed vocab tiles
    # (f32 exp; on v6e/v7x a bf16 exp would double EUP throughput if the EUP
    #  ever becomes the binding slot — not portable to v5e, so kept f32.)
    m_old = m_sc[i]
    m_new = jnp.maximum(m_old, jnp.max(logits, axis=-1, keepdims=True))
    l_sc[i] = (l_sc[i] * jnp.exp(m_old - m_new)
               + jnp.sum(jnp.exp(logits - m_new), axis=-1, keepdims=True))
    m_sc[i] = m_new

    # gather the logit at the label if it falls inside this vocab tile
    hit = vocab_ids == labels
    p_sc[i] = p_sc[i] + jnp.sum(jnp.where(hit, logits, 0.0),
                                axis=-1, keepdims=True)

    @pl.when(j == nj - 1)
    def _():
        lse = m_sc[i] + jnp.log(l_sc[i])                          # (tm, 1)
        valid = labels != -100
        per_tok = jnp.where(valid, lse - p_sc[i], 0.0)            # (tm, 1)
        loss_ref[...] = _splat(jnp.sum(per_tok), loss_ref.shape)
        cnt_ref[...] = _splat(jnp.sum(valid.astype(jnp.float32)), cnt_ref.shape)


# ---------------------------------------------------------------------------
# Kernel 2: SimCTG contrastive loss, row-tiled cosine-score blocks.
# grid = (B, S//tq), both "parallel".  norm_rep is pre-normalized (wrapper).
# loss_mask is built from 1-D row/col masks; the i==j exclusion is handled by
# subtracting the diagonal term analytically (diag score recomputed cheaply on
# the VPU from the same bf16 rows, so the correction matches the MXU value).
# ---------------------------------------------------------------------------
def cl_kernel(q_ref, k_ref, ids_row_ref, ids_all_ref, out_ref,
              *, margin, pad_token_id):
    qi = pl.program_id(1)

    q = q_ref[0]                                                  # (tq, D) bf16
    k = k_ref[0]                                                  # (S,  D) bf16
    tq, _ = q.shape
    S = k.shape[0]

    # cosine scores of this row block vs all positions; contract last dims
    scores = lax.dot_general(q, k,
                             dimension_numbers=(((1,), (1,)), ((), ())),
                             preferred_element_type=jnp.float32)  # (tq, S)

    # rows are L2-normalized -> gold (diagonal) score is 1.0
    loss_m = jnp.maximum(margin - (1.0 - scores), 0.0)            # (tq, S)

    not_pad_all = ids_all_ref[0] != pad_token_id                  # (S, 1) bool
    valid_len = jnp.sum(not_pad_all.astype(jnp.int32))            # scalar

    col_idx = lax.broadcasted_iota(jnp.int32, (1, S), 1)
    col_mask = (col_idx < valid_len).astype(jnp.float32)          # (1, S)

    row_idx = lax.broadcasted_iota(jnp.int32, (tq, 1), 0) + qi * tq
    not_pad_row = ids_row_ref[0] != pad_token_id                  # (tq, 1) bool
    row_mask = ((row_idx < valid_len) & not_pad_row).astype(jnp.float32)

    # diagonal correction: when row_mask[r]=1 its diagonal column is also
    # inside col_mask, so its contribution max(margin - (1 - s_rr), 0) must be
    # removed.  s_rr recomputed from the same bf16 row (matches the MXU diag).
    qf = q.astype(jnp.float32)
    diag = jnp.sum(qf * qf, axis=-1, keepdims=True)               # (tq, 1)
    diag_loss = jnp.maximum(margin - (1.0 - diag), 0.0)

    row_sum = jnp.sum(loss_m * col_mask, axis=-1, keepdims=True)  # (tq, 1)
    total = jnp.sum((row_sum - diag_loss) * row_mask)
    out_ref[...] = _splat(total, out_ref.shape)


# ---------------------------------------------------------------------------
# Wrapper: SimCTG.forward(input_ids, labels, margin) given hidden states & W_lm
# ---------------------------------------------------------------------------
def simctg_forward(hidden, w_lm, input_ids, labels, margin, pad_token_id,
                   *, tm=None, tv=None, tq=None):
    B, S, D = hidden.shape
    V = w_lm.shape[1]
    BS = B * S
    vmem_cap = _vmem_cap_bytes()

    # bf16 feeds the MXU at full rate and halves HBM traffic for the two big
    # operands (W_lm and hidden); accumulation stays f32 inside the kernels.
    hidden_bf16 = hidden.astype(jnp.bfloat16)
    w_bf16 = w_lm.astype(jnp.bfloat16)

    # ---- tile selection (bf16-friendly 16-sublane row tiles, 128-lane vocab)
    if tm is None:
        tm = min(512, _round_up(BS, 16))
    tm = max(16, _round_up(tm, 16))
    BS_pad = _round_up(BS, tm)

    if tv is None:
        tv = 2048
    tv = max(_LANES, _round_up(tv, _LANES))
    tv = min(tv, _round_up(V, _LANES))
    V_pad = _round_up(V, tv)
    gm, gv = BS_pad // tm, V_pad // tv

    hidden_flat = hidden_bf16.reshape(BS, D)
    labels_flat = labels.reshape(BS, 1).astype(jnp.int32)
    if BS_pad != BS:                       # padded rows are ignored (-100)
        hidden_flat = jnp.pad(hidden_flat, ((0, BS_pad - BS), (0, 0)))
        labels_flat = jnp.pad(labels_flat, ((0, BS_pad - BS), (0, 0)),
                              constant_values=-100)
    if V_pad != V:                         # padded vocab columns masked in-kernel
        w_bf16 = jnp.pad(w_bf16, ((0, 0), (0, V_pad - V)))

    ce_vmem_est = (2 * tm * D * 2                 # hidden tiles (double-buffered)
                   + 2 * D * tv * 2               # W tiles (double-buffered)
                   + 2 * tm * _LANES * 4          # label tiles (lane-padded)
                   + 4 * tm * tv * 4              # live (tm, tv) f32 temporaries
                   + 3 * gm * tm * _LANES * 4     # logsumexp state (lane-padded)
                   + 8 * _LANES * 4)              # partial outputs
    ce_vmem = int(min(max(2 * ce_vmem_est, 8 << 20), vmem_cap - (8 << 20)))

    loss_part, cnt_part = pl.pallas_call(
        functools.partial(ce_kernel, tm=tm, tv=tv,
                          v_real=(V if V_pad != V else None)),
        out_shape=(jax.ShapeDtypeStruct((gm, 1, _LANES), jnp.float32),
                   jax.ShapeDtypeStruct((gm, 1, _LANES), jnp.float32)),
        grid=(gv, gm),
        in_specs=[pl.BlockSpec((tm, D), lambda j, i: (i, 0)),
                  pl.BlockSpec((D, tv), lambda j, i: (0, j)),
                  pl.BlockSpec((tm, 1), lambda j, i: (i, 0))],
        out_specs=(pl.BlockSpec((1, 1, _LANES), lambda j, i: (i, 0, 0)),
                   pl.BlockSpec((1, 1, _LANES), lambda j, i: (i, 0, 0))),
        scratch_shapes=[pltpu.VMEM((gm, tm, 1), jnp.float32)] * 3,
        compiler_params=pltpu.CompilerParams(
            dimension_semantics=("arbitrary", "arbitrary"),
            vmem_limit_bytes=ce_vmem),
        cost_estimate=pl.CostEstimate(
            flops=int(2 * BS_pad * D * V_pad),
            transcendentals=int(BS_pad * V_pad),
            bytes_accessed=int(D * V_pad * 2 + gv * BS_pad * D * 2
                               + BS_pad * 4 + 2 * gm * _LANES * 4)),
    )(hidden_flat, w_bf16, labels_flat)

    loss_sum = jnp.sum(loss_part[:, 0, 0])
    cnt = jnp.sum(cnt_part[:, 0, 0])
    # NaN if every label is -100 (matches torch CrossEntropyLoss 'mean')
    mle_loss = loss_sum / cnt

    # ---- contrastive loss --------------------------------------------------
    # Normalize once in f32 (wrapper), feed bf16 norm_rep to the kernel.
    norm_rep = hidden * lax.rsqrt(jnp.sum(hidden * hidden, axis=-1,
                                          keepdims=True))
    nr_bf16 = norm_rep.astype(jnp.bfloat16)
    ids3 = input_ids.reshape(B, S, 1).astype(jnp.int32)

    if tq is None:
        tq = min(512, S)
    if tq != S and (S % tq != 0 or tq % 16 != 0):
        tq = S
    gq = S // tq

    cl_vmem_est = (2 * tq * D * 2 + 2 * S * D * 2       # q / k bf16 blocks
                   + 2 * tq * _LANES * 4 + 2 * S * _LANES * 4   # id blocks
                   + 4 * tq * S * 4 + tq * D * 4        # score-block temporaries
                   + 2 * _LANES * 4)
    cl_vmem = int(min(max(2 * cl_vmem_est, 8 << 20), vmem_cap - (8 << 20)))

    cl_part = pl.pallas_call(
        functools.partial(cl_kernel, margin=float(margin),
                          pad_token_id=int(pad_token_id)),
        out_shape=jax.ShapeDtypeStruct((B, gq, 1, _LANES), jnp.float32),
        grid=(B, gq),
        in_specs=[pl.BlockSpec((1, tq, D), lambda b, q: (b, q, 0)),
                  pl.BlockSpec((1, S, D), lambda b, q: (b, 0, 0)),
                  pl.BlockSpec((1, tq, 1), lambda b, q: (b, q, 0)),
                  pl.BlockSpec((1, S, 1), lambda b, q: (b, 0, 0))],
        out_specs=pl.BlockSpec((1, 1, 1, _LANES), lambda b, q: (b, q, 0, 0)),
        compiler_params=pltpu.CompilerParams(
            dimension_semantics=("parallel", "parallel"),
            vmem_limit_bytes=cl_vmem),
        cost_estimate=pl.CostEstimate(
            flops=int(2 * B * S * S * D),
            transcendentals=0,
            bytes_accessed=int(B * S * D * 2 * (1 + gq) + 2 * B * S * 4
                               + B * gq * _LANES * 4)),
    )(nr_bf16, nr_bf16, ids3, ids3)

    cl_loss = jnp.sum(cl_part[:, :, 0, 0]) / (1.0 * B * S)
    return mle_loss, cl_loss


# ---------------------------------------------------------------------------
# Pure-JAX reference (mirrors the PyTorch semantics, f32) for verification
# ---------------------------------------------------------------------------
def reference_forward(hidden, w_lm, input_ids, labels, margin, pad_token_id):
    B, S, D = hidden.shape
    logits = jnp.einsum("bsd,dv->bsv", hidden, w_lm)
    lf = logits.reshape(-1, logits.shape[-1])
    lab = labels.reshape(-1)
    lse = jax.scipy.special.logsumexp(lf, axis=-1)
    valid = lab != -100
    safe = jnp.where(valid, lab, 0)
    picked = jnp.take_along_axis(lf, safe[:, None], axis=-1)[:, 0]
    per = jnp.where(valid, lse - picked, 0.0)
    mle = jnp.sum(per) / jnp.sum(valid.astype(jnp.float32))

    norm_rep = hidden / jnp.linalg.norm(hidden, axis=2, keepdims=True)
    scores = jnp.einsum("bsd,btd->bst", norm_rep, norm_rep)
    gold = jnp.diagonal(scores, axis1=1, axis2=2)[..., None]
    loss_m = jnp.maximum(margin - (gold - scores), 0.0)
    input_mask = (input_ids != pad_token_id).astype(jnp.float32)
    valid_len = jnp.sum(input_mask, axis=-1).astype(jnp.int32)      # (B,)
    idx = jnp.arange(S)
    base = (idx[:, None] != idx[None, :]).astype(jnp.float32)
    lm = (base[None]
          * (idx[None, :, None] < valid_len[:, None, None])
          * (idx[None, None, :] < valid_len[:, None, None]))
    row = jnp.sum(loss_m * lm, axis=-1) * input_mask
    cl = jnp.sum(row) / (1.0 * B * S)
    return mle, cl


if __name__ == "__main__":
    # Small synthetic configuration consistent with the module's forward.
    # V=250 is deliberately NOT 128-aligned to exercise the vocab-padding /
    # in-kernel masking path.
    B, S, D, V = 2, 32, 32, 250
    pad_token_id = 0
    margin = 0.8

    key = jax.random.PRNGKey(0)
    k_ids, k_emb, k_pos = jax.random.split(key, 3)

    input_ids = jax.random.randint(k_ids, (B, S), 1, V, dtype=jnp.int32)
    input_ids = input_ids.at[1, -3:].set(pad_token_id)          # pads at the end

    labels = jnp.where(input_ids == pad_token_id, -100, (input_ids + 1) % V)
    labels = labels.astype(jnp.int32)

    # Deterministic synthetic stand-in for the pretrained LM backbone.
    emb = jax.random.normal(k_emb, (V, D), jnp.float32) * 0.02
    pos = jax.random.normal(k_pos, (S, D), jnp.float32) * 0.02
    h = emb[input_ids] + pos[None, :, :]
    mu = jnp.mean(h, axis=-1, keepdims=True)
    var = jnp.mean((h - mu) ** 2, axis=-1, keepdims=True)
    hidden = (h - mu) / jnp.sqrt(var + 1e-5)                    # (B, S, D), like ln_f
    w_lm = emb.T                                                # tied LM head (D, V)

    # tm=16, tv=128 -> CE grid (gv=2, gm=4): exercises the streamed vocab axis
    # (incl. a padded, masked last tile), the persistent per-row-tile online
    # logsumexp state, and tq=16 -> CL grid (2, 2) exercises row tiling.
    mle_loss, cl_loss = simctg_forward(hidden, w_lm, input_ids, labels,
                                       margin, pad_token_id,
                                       tm=16, tv=128, tq=16)
    mle_loss = jax.block_until_ready(mle_loss)
    cl_loss = jax.block_until_ready(cl_loss)

    ref_mle, ref_cl = reference_forward(hidden, w_lm, input_ids, labels,
                                        margin, pad_token_id)

    assert np.allclose(np.asarray(mle_loss), np.asarray(ref_mle),
                       rtol=1e-2, atol=1e-2), (mle_loss, ref_mle)
    assert np.allclose(np.asarray(cl_loss), np.asarray(ref_cl),
                       rtol=1e-2, atol=1e-2), (cl_loss, ref_cl)

    print("KERNEL_OK")
</pallas_src>

<mosaic_0001>
module attributes {stable_mosaic.version = 11 : i64} {
  func.func @ce_kernel(%arg0: i32, %arg1: i32, %arg2: memref<16x32xbf16, #tpu.memory_space<vmem>>, %arg3: memref<32x128xbf16, #tpu.memory_space<vmem>>, %arg4: memref<16x1xi32, #tpu.memory_space<vmem>>, %arg5: memref<1x1x128xf32, #tpu.memory_space<vmem>>, %arg6: memref<1x1x128xf32, #tpu.memory_space<vmem>>, %arg7: memref<4x16x1xf32, #tpu.memory_space<vmem>>, %arg8: memref<4x16x1xf32, #tpu.memory_space<vmem>>, %arg9: memref<4x16x1xf32, #tpu.memory_space<vmem>>) attributes {dimension_semantics = [#tpu.dimension_semantics<arbitrary>, #tpu.dimension_semantics<arbitrary>], iteration_bounds = array<i64: 2, 4>, scalar_prefetch = 0 : i64, scratch_operands = 3 : i64, tpu.core_type = #tpu.core_type<tc>, window_params = [{transform_indices = @transform_0, window_bounds = array<i64: 16, 32>}, {transform_indices = @transform_1, window_bounds = array<i64: 32, 128>}, {transform_indices = @transform_2, window_bounds = array<i64: 16, 1>}, {transform_indices = @transform_3, window_bounds = array<i64: 1, 1, 128>}, {transform_indices = @transform_4, window_bounds = array<i64: 1, 1, 128>}]} {
    %c0_i32 = arith.constant 0 : i32
    %0 = arith.cmpi eq, %arg0, %c0_i32 : i32
    %1 = arith.extui %0 : i1 to i32
    %c0_i32_0 = arith.constant 0 : i32
    %2 = arith.cmpi ne, %1, %c0_i32_0 : i32
    scf.if %2 {
      %cst_24 = arith.constant 0xFF800000 : f32
      %58 = vector.broadcast %cst_24 : f32 to vector<16x1xf32>
      %59 = arith.index_cast %arg1 : i32 to index
      %c0_25 = arith.constant 0 : index
      %c0_26 = arith.constant 0 : index
      %60 = vector.load %arg7[%59, %c0_25, %c0_26] : memref<4x16x1xf32, #tpu.memory_space<vmem>>, vector<1x16x1xf32>
      %61 = vector.shape_cast %60 : vector<1x16x1xf32> to vector<16x1xf32>
      %62 = vector.shape_cast %58 : vector<16x1xf32> to vector<1x16x1xf32>
      tpu.vector_store %arg7[%59, %c0_25, %c0_26], %62 {strides = array<i32>} : memref<4x16x1xf32, #tpu.memory_space<vmem>>, vector<1x16x1xf32>,
      %cst_27 = arith.constant 0.000000e+00 : f32
      %63 = vector.broadcast %cst_27 : f32 to vector<16x1xf32>
      %64 = arith.index_cast %arg1 : i32 to index
      %c0_28 = arith.constant 0 : index
      %c0_29 = arith.constant 0 : index
      %65 = vector.load %arg8[%64, %c0_28, %c0_29] : memref<4x16x1xf32, #tpu.memory_space<vmem>>, vector<1x16x1xf32>
      %66 = vector.shape_cast %65 : vector<1x16x1xf32> to vector<16x1xf32>
      %67 = vector.shape_cast %63 : vector<16x1xf32> to vector<1x16x1xf32>
      tpu.vector_store %arg8[%64, %c0_28, %c0_29], %67 {strides = array<i32>} : memref<4x16x1xf32, #tpu.memory_space<vmem>>, vector<1x16x1xf32>,
      %cst_30 = arith.constant 0.000000e+00 : f32
      %68 = vector.broadcast %cst_30 : f32 to vector<16x1xf32>
      %69 = arith.index_cast %arg1 : i32 to index
      %c0_31 = arith.constant 0 : index
      %c0_32 = arith.constant 0 : index
      %70 = vector.load %arg9[%69, %c0_31, %c0_32] : memref<4x16x1xf32, #tpu.memory_space<vmem>>, vector<1x16x1xf32>
      %71 = vector.shape_cast %70 : vector<1x16x1xf32> to vector<16x1xf32>
      %72 = vector.shape_cast %68 : vector<16x1xf32> to vector<1x16x1xf32>
      tpu.vector_store %arg9[%69, %c0_31, %c0_32], %72 {strides = array<i32>} : memref<4x16x1xf32, #tpu.memory_space<vmem>>, vector<1x16x1xf32>,
    } else {
    }
    %c0 = arith.constant 0 : index
    %c0_1 = arith.constant 0 : index
    %3 = vector.load %arg4[%c0, %c0_1] : memref<16x1xi32, #tpu.memory_space<vmem>>, vector<16x1xi32>
    %c0_2 = arith.constant 0 : index
    %c0_3 = arith.constant 0 : index
    %4 = vector.load %arg2[%c0_2, %c0_3] : memref<16x32xbf16, #tpu.memory_space<vmem>>, vector<16x32xbf16>
    %c0_4 = arith.constant 0 : index
    %c0_5 = arith.constant 0 : index
    %5 = vector.load %arg3[%c0_4, %c0_5] : memref<32x128xbf16, #tpu.memory_space<vmem>>, vector<32x128xbf16>
    %cst = arith.constant dense<0.000000e+00> : vector<16x128xf32>
    %6 = tpu.matmul %4, %5, %cst {dimension_numbers = #tpu.dot_dimension_numbers<[1], [0], [0], [1], [0, 0, 1, 1], [], []>} : vector<16x32xbf16>, vector<32x128xbf16>, vector<16x128xf32> -> vector<16x128xf32>
    %7 = tpu.iota {dimensions = array<i32: 1>} : vector<16x128xi32>
    %c128_i32 = arith.constant 128 : i32
    %8 = arith.muli %arg0, %c128_i32 : i32
    %9 = vector.broadcast %8 : i32 to vector<16x128xi32>
    %10 = arith.addi %7, %9 : vector<16x128xi32>
    %c250_i32 = arith.constant 250 : i32
    %11 = vector.broadcast %c250_i32 : i32 to vector<16x128xi32>
    %12 = arith.cmpi slt, %10, %11 : vector<16x128xi32>
    %cst_6 = arith.constant -1.000000e+30 : f32
    %13 = vector.broadcast %cst_6 : f32 to vector<16x128xf32>
    %14 = arith.select %12, %6, %13 : vector<16x128xi1>, vector<16x128xf32>
    %15 = arith.index_cast %arg1 : i32 to index
    %c0_7 = arith.constant 0 : index
    %c0_8 = arith.constant 0 : index
    %16 = vector.load %arg7[%15, %c0_7, %c0_8] : memref<4x16x1xf32, #tpu.memory_space<vmem>>, vector<1x16x1xf32>
    %17 = vector.shape_cast %16 : vector<1x16x1xf32> to vector<16x1xf32>
    %cst_9 = arith.constant dense<0xFF800000> : vector<16xf32>
    %18 = vector.multi_reduction <maximumf>, %14, %cst_9 [1] : vector<16x128xf32> to vector<16xf32>
    %19 = vector.shape_cast %18 : vector<16xf32> to vector<16x1xf32>
    %20 = arith.maximumf %17, %19 : vector<16x1xf32>
    %21 = arith.index_cast %arg1 : i32 to index
    %c0_10 = arith.constant 0 : index
    %c0_11 = arith.constant 0 : index
    %22 = vector.load %arg8[%21, %c0_10, %c0_11] : memref<4x16x1xf32, #tpu.memory_space<vmem>>, vector<1x16x1xf32>
    %23 = vector.shape_cast %22 : vector<1x16x1xf32> to vector<16x1xf32>
    %24 = arith.subf %17, %20 : vector<16x1xf32>
    %25 = math.exp %24 : vector<16x1xf32>
    %26 = arith.mulf %23, %25 : vector<16x1xf32>
    %27 = vector.broadcast %20 : vector<16x1xf32> to vector<16x128xf32>
    %28 = arith.subf %14, %27 : vector<16x128xf32>
    %29 = math.exp %28 : vector<16x128xf32>
    %cst_12 = arith.constant dense<0.000000e+00> : vector<16xf32>
    %30 = vector.multi_reduction <add>, %29, %cst_12 [1] : vector<16x128xf32> to vector<16xf32>
    %31 = vector.shape_cast %30 : vector<16xf32> to vector<16x1xf32>
    %32 = arith.addf %26, %31 : vector<16x1xf32>
    %33 = arith.index_cast %arg1 : i32 to index
    %c0_13 = arith.constant 0 : index
    %c0_14 = arith.constant 0 : index
    %34 = vector.load %arg8[%33, %c0_13, %c0_14] : memref<4x16x1xf32, #tpu.memory_space<vmem>>, vector<1x16x1xf32>
    %35 = vector.shape_cast %34 : vector<1x16x1xf32> to vector<16x1xf32>
    %36 = vector.shape_cast %32 : vector<16x1xf32> to vector<1x16x1xf32>
    tpu.vector_store %arg8[%33, %c0_13, %c0_14], %36 {strides = array<i32>} : memref<4x16x1xf32, #tpu.memory_space<vmem>>, vector<1x16x1xf32>,
    %37 = arith.index_cast %arg1 : i32 to index
    %c0_15 = arith.constant 0 : index
    %c0_16 = arith.constant 0 : index
    %38 = vector.load %arg7[%37, %c0_15, %c0_16] : memref<4x16x1xf32, #tpu.memory_space<vmem>>, vector<1x16x1xf32>
    %39 = vector.shape_cast %38 : vector<1x16x1xf32> to vector<16x1xf32>
    %40 = vector.shape_cast %20 : vector<16x1xf32> to vector<1x16x1xf32>
    tpu.vector_store %arg7[%37, %c0_15, %c0_16], %40 {strides = array<i32>} : memref<4x16x1xf32, #tpu.memory_space<vmem>>, vector<1x16x1xf32>,
    %41 = vector.broadcast %3 : vector<16x1xi32> to vector<16x128xi32>
    %42 = arith.cmpi eq, %10, %41 : vector<16x128xi32>
    %43 = arith.index_cast %arg1 : i32 to index
    %c0_17 = arith.constant 0 : index
    %c0_18 = arith.constant 0 : index
    %44 = vector.load %arg9[%43, %c0_17, %c0_18] : memref<4x16x1xf32, #tpu.memory_space<vmem>>, vector<1x16x1xf32>
    %45 = vector.shape_cast %44 : vector<1x16x1xf32> to vector<16x1xf32>
    %cst_19 = arith.constant 0.000000e+00 : f32
    %46 = vector.broadcast %cst_19 : f32 to vector<16x128xf32>
    %47 = arith.select %42, %14, %46 : vector<16x128xi1>, vector<16x128xf32>
    %cst_20 = arith.constant dense<0.000000e+00> : vector<16xf32>
    %48 = vector.multi_reduction <add>, %47, %cst_20 [1] : vector<16x128xf32> to vector<16xf32>
    %49 = vector.shape_cast %48 : vector<16xf32> to vector<16x1xf32>
    %50 = arith.addf %45, %49 : vector<16x1xf32>
    %51 = arith.index_cast %arg1 : i32 to index
    %c0_21 = arith.constant 0 : index
    %c0_22 = arith.constant 0 : index
    %52 = vector.load %arg9[%51, %c0_21, %c0_22] : memref<4x16x1xf32, #tpu.memory_space<vmem>>, vector<1x16x1xf32>
    %53 = vector.shape_cast %52 : vector<1x16x1xf32> to vector<16x1xf32>
    %54 = vector.shape_cast %50 : vector<16x1xf32> to vector<1x16x1xf32>
    tpu.vector_store %arg9[%51, %c0_21, %c0_22], %54 {strides = array<i32>} : memref<4x16x1xf32, #tpu.memory_space<vmem>>, vector<1x16x1xf32>,
    %c1_i32 = arith.constant 1 : i32
    %55 = arith.cmpi eq, %arg0, %c1_i32 : i32
    %56 = arith.extui %55 : i1 to i32
    %c0_i32_23 = arith.constant 0 : i32
    %57 = arith.cmpi ne, %56, %c0_i32_23 : i32
    scf.if %57 {
      %58 = arith.index_cast %arg1 : i32 to index
      %c0_24 = arith.constant 0 : index
      %c0_25 = arith.constant 0 : index
      %59 = vector.load %arg7[%58, %c0_24, %c0_25] : memref<4x16x1xf32, #tpu.memory_space<vmem>>, vector<1x16x1xf32>
      %60 = vector.shape_cast %59 : vector<1x16x1xf32> to vector<16x1xf32>
      %61 = arith.index_cast %arg1 : i32 to index
      %c0_26 = arith.constant 0 : index
      %c0_27 = arith.constant 0 : index
      %62 = vector.load %arg8[%61, %c0_26, %c0_27] : memref<4x16x1xf32, #tpu.memory_space<vmem>>, vector<1x16x1xf32>
      %63 = vector.shape_cast %62 : vector<1x16x1xf32> to vector<16x1xf32>
      %64 = math.log %63 : vector<16x1xf32>
      %65 = arith.addf %60, %64 : vector<16x1xf32>
      %c-100_i32 = arith.constant -100 : i32
      %66 = vector.broadcast %c-100_i32 : i32 to vector<16x1xi32>
      %67 = arith.cmpi ne, %3, %66 : vector<16x1xi32>
      %68 = arith.index_cast %arg1 : i32 to index
      %c0_28 = arith.constant 0 : index
      %c0_29 = arith.constant 0 : index
      %69 = vector.load %arg9[%68, %c0_28, %c0_29] : memref<4x16x1xf32, #tpu.memory_space<vmem>>, vector<1x16x1xf32>
      %70 = vector.shape_cast %69 : vector<1x16x1xf32> to vector<16x1xf32>
      %71 = arith.subf %65, %70 : vector<16x1xf32>
      %cst_30 = arith.constant 0.000000e+00 : f32
      %72 = vector.broadcast %cst_30 : f32 to vector<16x1xf32>
      %73 = arith.select %67, %71, %72 : vector<16x1xi1>, vector<16x1xf32>
      %74 = vector.shape_cast %73 : vector<16x1xf32> to vector<1x16x1xf32>
      %cst_31 = arith.constant dense<0.000000e+00> : vector<1xf32>
      %75 = vector.multi_reduction <add>, %74, %cst_31 [1, 2] : vector<1x16x1xf32> to vector<1xf32>
      %76 = vector.shape_cast %75 : vector<1xf32> to vector<1x1x1xf32>
      %77 = vector.extract %76[0, 0, 0] : f32 from vector<1x1x1xf32>
      %78 = vector.broadcast %77 : f32 to vector<1x1x1xf32>
      %79 = vector.shape_cast %78 : vector<1x1x1xf32> to vector<1x1x1xf32>
      %80 = vector.broadcast %79 : vector<1x1x1xf32> to vector<1x1x128xf32>
      %c0_32 = arith.constant 0 : index
      %c0_33 = arith.constant 0 : index
      %c0_34 = arith.constant 0 : index
      %81 = vector.load %arg5[%c0_32, %c0_33, %c0_34] : memref<1x1x128xf32, #tpu.memory_space<vmem>>, vector<1x1x128xf32>
      tpu.vector_store %arg5[%c0_32, %c0_33, %c0_34], %80 {strides = array<i32>} : memref<1x1x128xf32, #tpu.memory_space<vmem>>, vector<1x1x128xf32>,
      %82 = arith.extui %67 : vector<16x1xi1> to vector<16x1xi32>
      %83 = arith.sitofp %82 : vector<16x1xi32> to vector<16x1xf32>
      %84 = vector.shape_cast %83 : vector<16x1xf32> to vector<1x16x1xf32>
      %cst_35 = arith.constant dense<0.000000e+00> : vector<1xf32>
      %85 = vector.multi_reduction <add>, %84, %cst_35 [1, 2] : vector<1x16x1xf32> to vector<1xf32>
      %86 = vector.shape_cast %85 : vector<1xf32> to vector<1x1x1xf32>
      %87 = vector.extract %86[0, 0, 0] : f32 from vector<1x1x1xf32>
      %88 = vector.broadcast %87 : f32 to vector<1x1x1xf32>
      %89 = vector.shape_cast %88 : vector<1x1x1xf32> to vector<1x1x1xf32>
      %90 = vector.broadcast %89 : vector<1x1x1xf32> to vector<1x1x128xf32>
      %c0_36 = arith.constant 0 : index
      %c0_37 = arith.constant 0 : index
      %c0_38 = arith.constant 0 : index
      %91 = vector.load %arg6[%c0_36, %c0_37, %c0_38] : memref<1x1x128xf32, #tpu.memory_space<vmem>>, vector<1x1x128xf32>
      tpu.vector_store %arg6[%c0_36, %c0_37, %c0_38], %90 {strides = array<i32>} : memref<1x1x128xf32, #tpu.memory_space<vmem>>, vector<1x1x128xf32>,
    } else {
    }
    return
  }
  func.func @transform_0(%arg0: i32, %arg1: i32) -> (i32, i32) {
    %c0_i32 = arith.constant 0 : i32
    %c0_i32_0 = arith.constant 0 : i32
    return %arg1, %c0_i32 : i32, i32
  }
  func.func @transform_1(%arg0: i32, %arg1: i32) -> (i32, i32) {
    %c0_i32 = arith.constant 0 : i32
    %c0_i32_0 = arith.constant 0 : i32
    return %c0_i32, %arg0 : i32, i32
  }
  func.func @transform_2(%arg0: i32, %arg1: i32) -> (i32, i32) {
    %c0_i32 = arith.constant 0 : i32
    %c0_i32_0 = arith.constant 0 : i32
    return %arg1, %c0_i32 : i32, i32
  }
  func.func @transform_3(%arg0: i32, %arg1: i32) -> (i32, i32, i32) {
    %c0_i32 = arith.constant 0 : i32
    %c0_i32_0 = arith.constant 0 : i32
    %c0_i32_1 = arith.constant 0 : i32
    return %arg1, %c0_i32, %c0_i32_0 : i32, i32, i32
  }
  func.func @transform_4(%arg0: i32, %arg1: i32) -> (i32, i32, i32) {
    %c0_i32 = arith.constant 0 : i32
    %c0_i32_0 = arith.constant 0 : i32
    %c0_i32_1 = arith.constant 0 : i32
    return %arg1, %c0_i32, %c0_i32_0 : i32, i32, i32
  }
}

</mosaic_0001>

<bundles_post_ra>
// kernel: tpu_custom_call.1
= control target key start
LH: loop header
LB: loop body
LE: loop exit
PB: predicated region body
PF: predicated region fallthrough
CT: control target
= control target key end

     0   :  { %s1233_s0 = inlined_call_operand.vmem [shape: bf16[64,32], index: 0, kind: input, shape index: {}]   ;;  %s1234_s1 = inlined_call_operand.vmem [shape: bf16[32,256], index: 1, kind: input, shape index: {}]   ;;  %s1235_s2 = inlined_call_operand.vmem [shape: s32[64,1], index: 2, kind: input, shape index: {}]   ;;  %s1236_s3 = inlined_call_operand.hbm [shape: f32[4,1,128], index: 3, kind: output, shape index: {0}]   ;;  %s1237_s4 = inlined_call_operand.hbm [shape: f32[4,1,128], index: 4, kind: output, shape index: {1}]  }
   0x1   :  { %1242 = sst [smem:[#allocation16_spill]] %s1234_s1 }
   0x2   :  { %10 = vsyncpa [#allocation7], 0 }
   0x3   :  { %12 = vsyncpa [#allocation7 + $0x1], 0 }
   0x4   :  { %13 = vsyncpa [#allocation9], 0 }
   0x5   :  { %15 = vsyncpa [#allocation9 + $0x1], 0  ;;  %s997_s15 = smov 0   ;;  %s999_s16 = smov 0  }
   0x6   :  { %s1001_s17 = smov 0   ;;  %s1003_s18 = smov 0  }
   0x7   :  { %s1005_s19 = smov 0   ;;  %s1007_s20 = smov 0  }
   0x8   :  { %s1009_s21 = smov 0   ;;  %s1011_s22 = smov 0  }
   0x9   :  { %s1013_s23 = smov 0   ;;  %s1015_s24 = smov 0  }
   0xa LB: > { %1243 = sst [smem:[#allocation12_spill]] %s958_s22  ;;  %s672_s25 = sadd.s32 4294967295, %s966_s24   ;;  %s966_s24 = sphi %s1015_s24, %s21_s24   ;;  %s962_s23 = sphi %s1013_s23, %s1254_s23   ;;  %s958_s22 = sphi %s1011_s22, %s1253_s22   ;;  %s954_s21 = sphi %s1009_s21, %s1252_s21   ;;  %s950_s20 = sphi %s1007_s20, %s1251_s20   ;;  %s946_s19 = sphi %s1005_s19, %s1259_s19   ;;  %s942_s18 = sphi %s1003_s18, %s1258_s18   ;;  %s938_s17 = sphi %s1001_s17, %s1257_s17   ;;  %s934_s16 = sphi %s999_s16, %s1256_s16   ;;  %s930_s15 = sphi %s997_s15, %s1255_s15  }
   0xb   : > { %1244 = sst [smem:[#allocation13_spill]] %s962_s23  ;;  %s673_s26 = sadd.s32 4294967294, %s966_s24  }
   0xc   : > { %s30_s27 = sadd.s32 1, %s958_s22  ;;  %s33_s28 = sadd.s32 1, %s962_s23 }
   0xd   : > { %p31_p0 = scmp.ge.s32.totalorder %s30_s27, 4  ;;  %s66_s29 = sadd.s32 1, %s946_s19 }
   0xe   : > { %p73_p1 = scmp.ne.s32.totalorder %s946_s19, %s942_s18  ;;  %p74_p2 = scmp.eq.s32.totalorder %s966_s24, 0 }
   0xf   : > { %s1261_s27 = smov (%p31_p0, %s30_s27), 0  ;;  %s1263_s28 = smov (!%p31_p0, %s33_s28), %s962_s23 }
  0x10   : > { %1245 = sst [smem:[#allocation14_spill]] %s1261_s27  ;;  %p1058_p3 = por %p74_p2, %p73_p1 }
  0x11   : > { %s115_s5 = ssub.s32 %s958_s22, %s1261_s27  ;;  %p35_p4 = scmp.ge.s32.totalorder %s1263_s28, 2 }
  0x12   : > { %p116_p5 = scmp.eq.s32.totalorder %s115_s5, 0  ;;  %s118_s6 = sadd.s32 1, %s938_s17 }
  0x13   : > { %p128_p6 = scmp.ne.s32.totalorder %s938_s17, %s934_s16  ;;  %s1265_s28 = smov (%p35_p4, %s1263_s28), 0 }
  0x14   : > { %1247 = sst [smem:[#allocation15_spill]] %s1265_s28  ;;  %s63_s8 = ssub.s32 %s962_s23, %s1265_s28 }
  0x15   : > { %s1070_s7 = scalar_select %p116_p5, %s938_s17, %s118_s6  }
  0x16   : > { %p129_p7 = scmp.eq.s32.totalorder %s672_s25, 7  ;;  %p64_p8 = scmp.eq.s32.totalorder %s63_s8, 0 }
  0x17   : > { %p134_p9 = scmp.ne.s32.totalorder %s934_s16, %s930_s15  ;;  %p135_p11 = scmp.eq.s32.totalorder %s673_s26, 7 }
  0x18   : > { %p1076_p10 = por %p129_p7, %p128_p6  ;;  %p675_p13 = scmp.ge.s32.totalorder %s966_s24, 8 }
  0x19   : > { %s1081_s10 = scalar_select %p64_p8, %s946_s19, %s66_s29  }
  0x1a   : > { %p1083_p12 = por %p135_p11, %p134_p9  ;;  %177 = sbr.rel (%p675_p13) target bundleno = 45 (0x2d), region = 16 }
  0x1f   : > { %189 = sbr.rel (!%p1058_p3) target bundleno = 45 (0x2d), region = 24  ;;  %s191_s12 = sand.u32 (%p1058_p3), 1, %s946_s19  }
  0x20   : > { %s677_s13 = sshll.u32 (%p1058_p3), %s962_s23, 2  ;;  %s676_s14 = sshll.u32 (%p1058_p3), %s191_s12, 4 }
  0x21   : > { %s1250_s1 = sld [smem:[#allocation16_spill]] (%p1058_p3)  ;;  %s193_s29 = scalar_lea.vmem (%p1058_p3), [#allocation5], %s676_s14 }
  0x27   : > { %s195_s26 = scalar_lea.vmem %s1250_s1, %s677_s13 }
  0x28   : > { %v212_v0 = vld [vmem:[%s195_s26] sm:$0xf]  ;;  %v214_v1 = vld [vmem:[%s195_s26 + $0x8] sm:$0xf]  ;;  %v216_v2 = vld [vmem:[%s195_s26 + $0x10] sm:$0xf] }
  0x29   : > { %213 = vst [vmem:[%s193_s29] sm:$0xf] %v212_v0  ;;  %v218_v3 = vld [vmem:[%s195_s26 + $0x18] sm:$0xf] }
  0x2a   : > { %215 = vst [vmem:[%s193_s29 + $0x4] sm:$0xf] %v214_v1 }
  0x2b   : > { %217 = vst [vmem:[%s193_s29 + $0x8] sm:$0xf] %v216_v2 }
  0x2c   : > { %219 = vst [vmem:[%s193_s29 + $0xc] sm:$0xf] %v218_v3 }
  0x2d PF: > { %p678_p0 = scmp.ge.s32.totalorder %s966_s24, 1  ;;  %p259_p1 = scmp.lt.s32.totalorder %s966_s24, 9 }
  0x2f   : > { %p260_p2 = pnand %p678_p0, %p259_p1 }
  0x30   : > { %s266_s30 = sand.u32 (!%p260_p2), 1, %s942_s18   ;;  %s1099_s6 = sand.u32 (!%p260_p2), 1, %s934_s16  }
  0x31   : > { %263 = sbr.rel (%p260_p2) target bundleno = 813 (0x32d), region = 69  ;;  %s1101_s8 = sshll.u32 (!%p260_p2), %s266_s30, 4 }
  0x32   : > { %s680_s12 = sshll.u32 (!%p260_p2), %s950_s20, 1  ;;  %s268_s28 = scalar_lea.vmem (!%p260_p2), [#allocation5], %s1101_s8 }
  0x33   : > { %p305_p3 = scmp.lt.s32.totalorder (!%p260_p2), %s680_s12, 7  ;;  %s297_s27 = scalar_lea.vmem (!%p260_p2), [#allocation6], %s1099_s6 }
  0x34   : > { %s303_s23 = scalar_lea.vmem (!%p260_p2), [#allocation8], %s1099_s6  ;;  %p684_p4 = scmp.ne.s32.totalorder (!%p260_p2), %s954_s21, 0 }
  0x36   : > { %s1267_s12 = smov (!%p305_p3, %s680_s12), 7  ;;  %320 = sbr.rel (%p684_p4) target bundleno = 66 (0x42), region = 77 }
  0x37   : > { %s681_s13 = sshll.u32 %s1267_s12, 2  ;;  %s683_s14 = sshll.u32 %s1267_s12, 3 }
  0x38   : > { %s308_s26 = scalar_lea.vmem %s1233_s0, %s681_s13  ;;  %s1110_s18 = scalar_lea.vmem %s1235_s2, %s683_s14 }
  0x39   : > { %s685_s30 = sshll.u32 (!%p684_p4), %s950_s20, 4 }
  0x3a   : > { %s322_s22 = scalar_lea.vmem (!%p684_p4), [#allocation2], %s685_s30  ;;  %s326_s12 = scalar_lea.vmem (!%p684_p4), [#allocation3], %s685_s30 }
  0x3b   : > { %vm323_vm0 = vcmask 7168   ;;  %v968_v4 = vmov -inf   ;;  %v969_v5 = vmov 0.0   ;;  %s329_s1 = scalar_lea.vmem [#allocation4], %s685_s30 }
  0x3c   : > { %324 = vst.msk [vmem:[%s322_s22] sm:$0xff] %vm323_vm0, %v968_v4 }
  0x3d   : > { %325 = vst.msk [vmem:[%s322_s22 + $0x8] sm:$0xff] %vm323_vm0, %v968_v4 }
  0x3e   : > { %327 = vst.msk [vmem:[%s326_s12] sm:$0xff] %vm323_vm0, %v969_v5 }
  0x3f   : > { %328 = vst.msk [vmem:[%s326_s12 + $0x8] sm:$0xff] %vm323_vm0, %v969_v5 }
  0x40   : > { %330 = vst.msk [vmem:[%s329_s1] sm:$0xff] %vm323_vm0, %v969_v5 }
  0x41   : > { %331 = vst.msk [vmem:[%s329_s1 + $0x8] sm:$0xff] %vm323_vm0, %v969_v5 }
  0x42 PF: > { %v708_v6 = vld [vmem:[%s268_s28 + $0x8] sm:$0xff]  ;;  %v970_v7 = vmov 0   ;;  %v1118_v8 = vld [vmem:[%s1110_s18] sm:$0xff]  ;;  %vm357_vm1 = vcmask 261120   ;;  %v375_v12 = vlaneseq  ;;  %s699_s22 = sshll.u32 %s954_s21, 7  ;;  %vm426_vm4 = vcmask 7168  }
  0x43   : > { %810 = vset.pattern.permute.xlu2 %v970_v7  ;;  %809 = vset.pattern.permute.xlu1 %v970_v7  ;;  %v707_v9 = vld [vmem:[%s268_s28] sm:$0xff]  ;;  %v1122_v11 = vld [vmem:[%s1110_s18 + $0x8] sm:$0xff]  ;;  %v378_v14 = vstv %s699_s22  ;;  %s1127_s28 = sshll.u32 %s950_s20, 4  ;;  %p701_p5 = scmp.ne.s32.totalorder %s954_s21, 1 }
  0x44   : > { %367 = vmatpush.bf16.msra.mxu0 %v708_v6  ;;  %432 = vperm.xlu2 %810, %v1118_v8   ;;  %v706_v10 = vld [vmem:[%s308_s26] sm:$0xff]  ;;  %v376_v13 = vand.u32 127, %v375_v12  ;;  %s1130_s8 = scalar_lea.vmem [#allocation2], %s1127_s28  ;;  %s1134_s13 = scalar_lea.vmem [#allocation4], %s1127_s28 }
  0x45   : > { %811 = vset.pattern.permute.xlu0 %v970_v7  ;;  %v385_v23 = vld [vmem:[%s1130_s8] sm:$0xff]  ;;  %v386_v30 = vld [vmem:[%s1130_s8 + $0x8] sm:$0xff]  ;;  %s393_s14 = scalar_lea.vmem [#allocation3], %s1127_s28 }
  0x46   : > { %v379_v15 = vadd.s32 %v378_v14, %v376_v13  ;;  %v394_v46 = vld [vmem:[%s393_s14] sm:$0xff]  ;;  %v395_v51 = vld [vmem:[%s393_s14 + $0x8] sm:$0xff] }
  0x48   : > { %368 = vmatpush.bf16.msra.mxu0 %v707_v9  ;;  %vm380_vm2 = vcmp.lt.s32.totalorder %v379_v15, 250  ;;  %v440_v24 = vld [vmem:[%s1134_s13] sm:$0xff]  ;;  %v441_v52 = vld [vmem:[%s1134_s13 + $0x8] sm:$0xff] }
  0x4b   : > { %698 = vmatmul.msk.bf16.vlgmr.msra.gmra.mxu0 %vm357_vm1, %v706_v10 }
  0x4c   : > { %435 = vperm.xlu2 %810, %v1122_v11  }
  0x9e   : > { %v433_v16 = vpop.permute.xlu2 %432 }
  0x9f   : > { %vm437_vm3 = vcmp.eq.s32.totalorder %v379_v15, %v433_v16 }
  0xa6   : > { %v436_v22 = vpop.permute.xlu2 %435 }
  0xa7   : > { %vm438_vm5 = vcmp.eq.s32.totalorder %v379_v15, %v436_v22 }
  0xc8   : > { %v370_v17 = vpop.f32.mrf.mxu0 }
  0xc9   : > { %v381_v18 = vsel %vm380_vm2, %v370_v17, -1e+30 }
  0xca   : > { %387 = vmax.xlane.f32.xlu0 %v381_v18  ;;  %v442_v19 = vsel %vm437_vm3, %v381_v18, 0.0 }
  0xcb   : > { %444 = vadd.xlane.f32.xlu2 %v442_v19 }
  0xd0   : > { %v372_v20 = vpop.f32.mrf.mxu0 }
  0xd1   : > { %v382_v21 = vsel %vm380_vm2, %v372_v20, -1e+30 }
  0xd2   : > { %389 = vmax.xlane.f32.xlu0 %v382_v21  ;;  %v443_v42 = vsel %vm438_vm5, %v382_v21, 0.0 }
 0x13d   : > { %v388_v25 = vpop.xlane.xlu0 %387 }
 0x13e   : > { %v391_v26 = vmax.f32 %v385_v23, %v388_v25  ;;  %v445_v27 = vpop.xlane.xlu2 %444 }
 0x13f   : > { %v448_v28 = vadd.f32 %v445_v27, %v440_v24 }
 0x140   : > { %v396_v29 = vsub.f32 %v385_v23, %v391_v26  ;;  %429 = vst.msk [vmem:[%s1130_s8] sm:$0xff] %vm426_vm4, %v391_v26  ;;  %406 = vperm.xlu1 %809, %v391_v26  }
 0x141   : > { %450 = vst.msk [vmem:[%s1134_s13] sm:$0xff] %vm426_vm4, %v448_v28 }
 0x142   : > { %v398_v43 = vmul.f32 1.442695, %v396_v29 }
 0x145   : > { %v390_v31 = vpop.xlane.xlu0 %389 }
 0x146   : > { %v392_v32 = vmax.f32 %v386_v30, %v390_v31 }
 0x148   : > { %v397_v33 = vsub.f32 %v386_v30, %v392_v32  ;;  %430 = vst.msk [vmem:[%s1130_s8 + $0x8] sm:$0xff] %vm426_vm4, %v392_v32  ;;  %411 = vperm.xlu1 %809, %v392_v32  }
 0x14a   : > { %v400_v44 = vmul.f32 1.442695, %v397_v33 }
 0x1b2   : > { %v407_v34 = vpop.permute.xlu1 %406 }
 0x1b3   : > { %v414_v35 = vsub.f32 %v381_v18, %v407_v34 }
 0x1b5   : > { %v416_v36 = vmul.f32 1.442695, %v414_v35 }
 0x1b7   : > { %812 = vpow2.f32 %v416_v36 }
 0x1ba   : > { %v412_v37 = vpop.permute.xlu1 %411 }
 0x1bb   : > { %v415_v38 = vsub.f32 %v382_v21, %v412_v37 }
 0x1bd   : > { %v813_v39 = vpop.eup %812  ;;  %v418_v40 = vmul.f32 1.442695, %v415_v38 }
 0x1be   : > { %420 = vadd.xlane.f32.xlu0 %v813_v39 }
 0x1bf   : > { %814 = vpow2.f32 %v418_v40 }
 0x1c0   : > { %816 = vpow2.f32 %v398_v43 }
 0x1c1   : > { %818 = vpow2.f32 %v400_v44 }
 0x1c5   : > { %v815_v41 = vpop.eup %814 }
 0x1c6   : > { %422 = vadd.xlane.f32.xlu1 %v815_v41  ;;  %446 = vadd.xlane.f32.xlu0 %v443_v42  ;;  %v817_v45 = vpop.eup %816 }
 0x1c7   : > { %v402_v47 = vmul.f32 %v817_v45, %v394_v46  ;;  %v819_v50 = vpop.eup %818 }
 0x1c8   : > { %v403_v53 = vmul.f32 %v819_v50, %v395_v51 }
 0x231   : > { %v421_v48 = vpop.xlane.xlu0 %420 }
 0x232   : > { %v424_v49 = vadd.f32 %v421_v48, %v402_v47 }
 0x234   : > { %427 = vst.msk [vmem:[%s393_s14] sm:$0xff] %vm426_vm4, %v424_v49 }
 0x239   : > { %v423_v54 = vpop.xlane.xlu1 %422  ;;  %v447_v55 = vpop.xlane.xlu0 %446  ;;  %455 = sbr.rel (%p701_p5) target bundleno = 785 (0x311), region = 81 }
 0x23a   : > { %v425_v56 = vadd.f32 %v423_v54, %v403_v53  ;;  %v449_v57 = vadd.f32 %v447_v55, %v441_v52 }
 0x23c   : > { %428 = vst.msk [vmem:[%s393_s14 + $0x8] sm:$0xff] %vm426_vm4, %v425_v56 }
 0x23d   : > { %451 = vst.msk [vmem:[%s1134_s13 + $0x8] sm:$0xff] %vm426_vm4, %v449_v57 }
 0x23e   : > { %v458_v58 = vld [vmem:[%s393_s14] sm:$0xff]  ;;  %v457_v63 = vld [vmem:[%s1130_s8 + $0x8] sm:$0xff]  ;;  %vm466_vm6 = vcmp.ne.s32.totalorder %v1118_v8, 4294967196  ;;  %vm467_vm7 = vcmp.ne.s32.totalorder %v1122_v11, 4294967196  ;;  %v971_v15 = vmov 0.0  }
 0x23f   : > { %820 = vlog2.f32 %v458_v58  ;;  %v456_v61 = vld [vmem:[%s1130_s8] sm:$0xff]  ;;  %v702_v16 = vsel %vm466_vm6, 1.0, %v971_v15  ;;  %v703_v17 = vsel %vm467_vm7, 1.0, %v971_v15 }
 0x240   : > { %v468_v2 = vld [vmem:[%s1134_s13] sm:$0xff]  ;;  %v492_v18 = vsel %vm426_vm4, %v702_v16, 0.0  ;;  %v493_v19 = vsel %vm426_vm4, %v703_v17, 0.0 }
 0x241   : > { %v494_v8 = vadd.f32 %v493_v19, %v492_v18 }
 0x243   : > { %v459_v59 = vld [vmem:[%s393_s14 + $0x8] sm:$0xff] }
 0x244   : > { %822 = vlog2.f32 %v459_v59  ;;  %v469_v4 = vld [vmem:[%s1134_s13 + $0x8] sm:$0xff] }
 0x245   : > { %v821_v60 = vpop.eup %820 }
 0x246   : > { %v461_v0 = vmul.f32 0.6931472, %v821_v60 }
 0x248   : > { %v464_v3 = vadd.f32 %v461_v0, %v456_v61 }
 0x24a   : > { %v823_v62 = vpop.eup %822  ;;  %v470_v6 = vsub.f32 %v464_v3, %v468_v2 }
 0x24b   : > { %v463_v1 = vmul.f32 0.6931472, %v823_v62 }
 0x24c   : > { %v472_v9 = vsel %vm466_vm6, %v470_v6, 0.0 }
 0x24d   : > { %v465_v5 = vadd.f32 %v463_v1, %v457_v63  ;;  %v474_v12 = vsel %vm426_vm4, %v472_v9, 0.0 }
 0x24f   : > { %v471_v7 = vsub.f32 %v465_v5, %v469_v4 }
 0x251   : > { %v473_v10 = vsel %vm467_vm7, %v471_v7, 0.0 }
 0x252   : > { %v475_v13 = vsel %vm426_vm4, %v473_v10, 0.0 }
 0x253   : > { %v476_v14 = vadd.f32 %v475_v13, %v474_v12 }
 0x255   : > { %477 = vadd.xlane.f32.xlu0 %v476_v14 }
 0x25d   : > { %495 = vadd.xlane.f32.xlu0 %v494_v8 }
 0x2c8   : > { %v478_v11 = vpop.xlane.xlu0 %477 }
 0x2c9   : > { %v479_v20 = vrot.slane %v478_v11, 4 }
 0x2cb   : > { %v480_v21 = vadd.f32 %v479_v20, %v478_v11 }
 0x2cd   : > { %v481_v22 = vrot.slane %v480_v21, 2 }
 0x2cf   : > { %v482_v23 = vadd.f32 %v481_v22, %v480_v21 }
 0x2d0   : > { %v496_v24 = vpop.xlane.xlu0 %495 }
 0x2d1   : > { %v497_v25 = vrot.slane %v496_v24, 4  ;;  %v483_v26 = vrot.slane %v482_v23, 1 }
 0x2d3   : > { %v498_v27 = vadd.f32 %v497_v25, %v496_v24  ;;  %v484_v28 = vadd.f32 %v483_v26, %v482_v23 }
 0x2d5   : > { %v499_v29 = vrot.slane %v498_v27, 2  ;;  %709 = vpush %v484_v28 }
 0x2d7   : > { %v500_v30 = vadd.f32 %v499_v29, %v498_v27 }
 0x2d9   : > { %v501_v31 = vrot.slane %v500_v30, 1 }
 0x2db   : > { %v502_v32 = vadd.f32 %v501_v31, %v500_v30 }
 0x2dd   : > { %711 = vpush %v502_v32 }
 0x306   : > { %s710_s21 = spop %709 }
 0x307   : > { %v486_v33 = vstv %s710_s21 }
 0x308   : > { %487 = vst [vmem:[%s297_s27] sm:$0x1] %v486_v33 }
 0x30e   : > { %s712_s25 = spop %711 }
 0x30f   : > { %v504_v34 = vstv %s712_s25 }
 0x310   : > { %505 = vst [vmem:[%s303_s23] sm:$0x1] %v504_v34 }
 0x311 PF: > { %s519_s29 = scalar_lea.hbm %s1236_s3, %s950_s20  ;;  %s521_s18 = sshll.u32 %s297_s27, 4  ;;  %s522_s18 = int_to_ptr.vmem [resolvable:$true] %s521_s18 }
 0x312   : > { %s523_s30 = sshll.u32 %s519_s29, 4  ;;  %s507_s12 = scalar_lea.sflag [#allocation7], %s1099_s6  ;;  %s524_s30 = int_to_ptr.hbm [resolvable:$true] %s523_s30 }
 0x313   : > { %s838_s1 = sshra.s32 %s524_s30, 4  ;;  %s844_s13 = scalar_lea.hbm %s1236_s3, 4  ;;  %s839_s1 = int_to_ptr.hbm [resolvable:$true] %s838_s1 }
 0x314   : > { %s840_s22 = scalar_lea.hbm %s839_s1, 1  ;;  %p845_p9 = scmp.lt.s32.totalorder %s839_s1, %s1236_s3 }
 0x315   : > { %p841_p6 = scmp.ne.s32.totalorder %s839_s1, %s840_s22  ;;  %p846_p11 = scmp.lt.s32.totalorder %s844_s13, %s840_s22 }
 0x317   : > { %p842_p7 = pnand %p841_p6, %p1076_p10  ;;  %p847_p13 = por %p846_p11, %p845_p9 }
 0x319   : > { %p843_p8 = pneg %p842_p7 }
 0x31b   : > { %p848_p0 = pnand %p847_p13, %p843_p8 }
 0x31d   : > { %851 = shalt.err (!%p848_p0)
}
 0x31e   : > { %713 = dma.vmem_to_hbm [thread:$0]  (%p1076_p10), %s522_s18, 16, %s524_s30, %s507_s12  }
 0x31f   : > { %s532_s5 = scalar_lea.hbm %s1237_s4, %s950_s20  ;;  %s534_s26 = sshll.u32 %s303_s23, 4  ;;  %s535_s26 = int_to_ptr.vmem [resolvable:$true] %s534_s26 }
 0x320   : > { %s536_s29 = sshll.u32 %s532_s5, 4  ;;  %s511_s1 = scalar_lea.sflag [#allocation9], %s1099_s6  ;;  %s537_s29 = int_to_ptr.hbm [resolvable:$true] %s536_s29 }
 0x321   : > { %s866_s22 = sshra.s32 %s537_s29, 4  ;;  %s872_s18 = scalar_lea.hbm %s1237_s4, 4  ;;  %s867_s22 = int_to_ptr.hbm [resolvable:$true] %s866_s22 }
 0x322   : > { %s868_s28 = scalar_lea.hbm %s867_s22, 1  ;;  %p873_p4 = scmp.lt.s32.totalorder %s867_s22, %s1237_s4 }
 0x323   : > { %p869_p1 = scmp.ne.s32.totalorder %s867_s22, %s868_s28  ;;  %p874_p5 = scmp.lt.s32.totalorder %s872_s18, %s868_s28 }
 0x325   : > { %p870_p2 = pnand %p869_p1, %p1076_p10  ;;  %p875_p6 = por %p874_p5, %p873_p4 }
 0x327   : > { %p871_p3 = pneg %p870_p2 }
 0x329   : > { %p876_p7 = pnand %p875_p6, %p871_p3 }
 0x32b   : > { %879 = shalt.err (!%p876_p7)
}
 0x32c   : > { %714 = dma.vmem_to_hbm [thread:$0]  (%p1076_p10), %s535_s26, 16, %s537_s29, %s511_s1  }
 0x32d PF: > { %p724_p8 = scmp.ge.s32.totalorder %s966_s24, 2  ;;  %s548_s20 = sand.u32 1, %s930_s15  }
 0x32e   : > { %s549_s23 = scalar_lea.sflag [#allocation7], %s548_s20 }
 0x32f   : > { %p718_p9 = pnand %p724_p8, %p1083_p12 }
 0x331   : > { %p719_p11 = pneg %p718_p9 }
 0x333   : > { %921 = dma.done.wait (%p719_p11), %s549_s23, 16  }
 0x334   : > { %923 = vsyncadd (%p719_p11), %s549_s23, 4294967280  ;;  %s558_s6 = scalar_lea.sflag [#allocation9], %s548_s20 }
 0x335   : > { %925 = dma.done.wait (%p719_p11), %s558_s6, 16  }
 0x336   : > { %927 = vsyncadd (%p719_p11), %s558_s6, 4294967280  ;;  %s21_s24 = sadd.s32 1, %s966_s24   ;;  %s1251_s20 = sld [smem:[#allocation12_spill]] }
 0x337   : > { %p18_p13 = scmp.ge.s32.totalorder %s21_s24, 10   ;;  %s1252_s21 = sld [smem:[#allocation13_spill]] }
 0x338   : > { %s1253_s22 = sld [smem:[#allocation14_spill]]  ;;  %s1255_s15 = smov %s934_s16 }
 0x339   : > { %s1254_s23 = sld [smem:[#allocation15_spill]]  ;;  %s1256_s16 = smov %s938_s17 }
 0x33a   : > { %s1257_s17 = smov %s1070_s7  ;;  %s1258_s18 = smov %s946_s19 }
 0x33b   : > { %s1259_s19 = smov %s1081_s10  ;;  %20 = sbr.rel (!%p18_p13) target bundleno = 10 (0xa), region = 150 }
 0x340   :  { %563 = vsyncpa [#allocation7], 1 }
 0x341   :  { %565 = vsyncpa [#allocation7 + $0x1], 1 }
 0x342   :  { %566 = vsyncpa [#allocation9], 1 }
 0x343   :  { %568 = vsyncpa [#allocation9 + $0x1], 1 }

</bundles_post_ra>
